<compile_context>
chip_gen: v7x
topology: tpu7x:2x2x1
jax: 0.10.0
libtpu: 0.0.40
codegen_flags: <defaults>
</compile_context>

<pallas_src>
import functools
import math

import jax
import jax.numpy as jnp
from jax.experimental import pallas as pl
from jax.experimental.pallas import tpu as pltpu

_LANES = 128
_MAX_BLOCK_ROWS = 2048  # 2048 sublane-rows * 128 lanes = 262144 samples / step


def _round_up(x, m):
    return (x + m - 1) // m * m


def _weighted_soft_ce_kernel(x_ref, y_ref, out_ref, *,
                             n_classes, class_weights, block_rows, total_n,
                             normalize_targets, reduction, mask_padding):
    i = pl.program_id(0)

    x = x_ref[...].astype(jnp.float32)   # (C, block_rows, 128)
    y = y_ref[...].astype(jnp.float32)

    # Unroll the tiny class axis; each slice is a fully lane-dense
    # (block_rows, 128) slab -> pure full-width VPU/EUP work.
    xs = [x[c] for c in range(n_classes)]
    ys = [y[c] for c in range(n_classes)]

    # Numerically stable log-sum-exp over classes.
    m = xs[0]
    for c in range(1, n_classes):
        m = jnp.maximum(m, xs[c])
    s = jnp.exp(xs[0] - m)
    for c in range(1, n_classes):
        s = s + jnp.exp(xs[c] - m)
    lse = m + jnp.log(s)                          # (block_rows, 128)

    y_sum = ys[0]
    yx = ys[0] * xs[0]
    for c in range(1, n_classes):
        y_sum = y_sum + ys[c]
        yx = yx + ys[c] * xs[c]

    # Fixed class weights ([4, 0, 4] in the module) folded in as constants;
    # zero-weight classes are skipped.  Weighting uses RAW targets (module).
    wy = None
    for c in range(n_classes):
        wc = class_weights[c]
        if wc == 0.0:
            continue
        term = ys[c] if wc == 1.0 else wc * ys[c]
        wy = term if wy is None else wy + term
    if wy is None:
        wy = jnp.zeros_like(y_sum)

    if normalize_targets:
        # CE against normalized targets: lse - (sum_c y_c x_c) / (sum_c y_c).
        # NOTE: all-zero target rows give inf/nan, same as the reference.
        per_sample = lse - yx * pl.reciprocal(y_sum, approx=False)
    else:
        per_sample = y_sum * lse - yx             # == -sum_c y_c log_softmax_c

    loss = per_sample * wy                        # (block_rows, 128)

    def write(val):
        if reduction == "none":
            out_ref[...] = val                                   # lane-dense store
        else:
            # Per-lane partial sums for this block; final reduce in wrapper.
            out_ref[...] = jnp.sum(val, axis=0, keepdims=True)   # (1, 128)

    if mask_padding:
        # Only needed when normalize_targets can turn padded (all-zero-target)
        # samples into nan AND the output is reduced.  Padding only ever lives
        # in the last grid block, so gate the mask there.
        last = pl.num_programs(0) - 1

        @pl.when(i != last)
        def _():
            write(loss)

        @pl.when(i == last)
        def _():
            row = jax.lax.broadcasted_iota(jnp.int32, loss.shape, 0)
            lane = jax.lax.broadcasted_iota(jnp.int32, loss.shape, 1)
            sample = (i * block_rows + row) * _LANES + lane
            write(jnp.where(sample < total_n, loss, 0.0))
    else:
        # Raw-target path: padded columns have y == 0, so y_sum = yx = wy = 0
        # and loss is exactly 0 without any masking.
        write(loss)


@functools.partial(jax.jit,
                   static_argnames=("class_weights", "normalize_targets",
                                    "reduction"))
def fixed_weighted_soft_target_ce_loss(inputs, targets,
                                       class_weights=(4.0, 0.0, 4.0),
                                       normalize_targets=False,
                                       reduction="mean"):
    """inputs, targets: (N, C) arrays (f32 or bf16). class_weights: static floats."""
    n, c = inputs.shape
    class_weights = tuple(float(w) for w in class_weights)
    assert len(class_weights) == c

    # Tiling over the sample axis: big blocks (per-step overhead amortized),
    # but always >= 2 grid blocks when possible so both v7x TCs get work.
    n_rows_min = max(int(pl.cdiv(n, _LANES)), 1)
    if n_rows_min <= 8:
        block_rows = n_rows_min            # single block (== full dim -> legal)
    else:
        target_blocks = max(2, int(pl.cdiv(n_rows_min, _MAX_BLOCK_ROWS)))
        block_rows = _round_up(int(pl.cdiv(n_rows_min, target_blocks)), 8)
        block_rows = min(block_rows, _MAX_BLOCK_ROWS)
    n_rows = _round_up(n_rows_min, block_rows)
    n_pad = n_rows * _LANES
    num_blocks = n_rows // block_rows

    def relayout(a):
        a = jnp.transpose(a)                              # (C, N): samples on lanes
        if n_pad != n:
            a = jnp.pad(a, ((0, 0), (0, n_pad - n)))
        return a.reshape(c, n_rows, _LANES)

    # Kept in the input dtype (bf16 stays bf16); fusible into the pallas_call
    # via allow_input_fusion below since everything is under one jit.
    x3 = relayout(inputs)
    y3 = relayout(targets)

    if reduction == "none":
        out_shape = jax.ShapeDtypeStruct((n_rows, _LANES), jnp.float32)
        out_spec = pl.BlockSpec((block_rows, _LANES), lambda i: (i, 0))
    else:
        out_shape = jax.ShapeDtypeStruct((1, num_blocks * _LANES), jnp.float32)
        out_spec = pl.BlockSpec((1, _LANES), lambda i: (0, i))

    # Padded samples only matter when normalization can produce nan AND the
    # output is reduced ('none' is sliced back to the true N in the wrapper).
    mask_padding = bool(normalize_targets and reduction != "none" and n_pad > n)

    kernel = functools.partial(
        _weighted_soft_ce_kernel,
        n_classes=c, class_weights=class_weights, block_rows=block_rows,
        total_n=n, normalize_targets=normalize_targets, reduction=reduction,
        mask_padding=mask_padding)

    in_bytes = (jnp.dtype(inputs.dtype).itemsize
                + jnp.dtype(targets.dtype).itemsize) * n_pad * c
    out_bytes = 4 * math.prod(out_shape.shape)
    cost = pl.CostEstimate(
        flops=12 * n_pad * c,
        transcendentals=(c + 1) * n_pad,
        bytes_accessed=in_bytes + out_bytes)

    out = pl.pallas_call(
        kernel,
        out_shape=out_shape,
        grid_spec=pltpu.PrefetchScalarGridSpec(
            num_scalar_prefetch=0,
            grid=(num_blocks,),
            in_specs=[
                pl.BlockSpec((c, block_rows, _LANES), lambda i: (0, i, 0)),
                pl.BlockSpec((c, block_rows, _LANES), lambda i: (0, i, 0)),
            ],
            out_specs=out_spec,
        ),
        compiler_params=pltpu.CompilerParams(
            dimension_semantics=("parallel",),
            allow_input_fusion=[True, True],
            vmem_limit_bytes=32 * 1024 * 1024,
        ),
        cost_estimate=cost,
    )(x3, y3)

    if reduction == "none":
        return out.reshape(-1)[:n]
    total = jnp.sum(out)
    if reduction == "mean":
        return total / jnp.float32(n)      # divide by the TRUE N, not padded N
    return total


def _reference(inputs, targets, class_weights, normalize_targets, reduction):
    x = inputs.astype(jnp.float32)
    y = targets.astype(jnp.float32)
    y_ce = y / jnp.sum(y, axis=-1, keepdims=True) if normalize_targets else y
    logp = jax.nn.log_softmax(x, axis=-1)
    loss = -jnp.sum(y_ce * logp, axis=-1)
    loss = loss * jnp.sum(class_weights * y, axis=-1)   # raw targets (module)
    if reduction == "mean":
        return loss.mean()
    if reduction == "sum":
        return loss.sum()
    return loss


if __name__ == "__main__":
    key = jax.random.PRNGKey(0)
    k1, k2, k3, k4 = jax.random.split(key, 4)

    cw = (4.0, 0.0, 4.0)            # module's fixed class weights -> C = 3
    cw_arr = jnp.array(cw, dtype=jnp.float32)

    # Small shape consistent with the module: (N=20 samples, C=3 classes);
    # N deliberately not a tile multiple.
    N, C = 20, 3
    inputs = jax.random.normal(k1, (N, C), dtype=jnp.float32)
    raw = jax.random.uniform(k2, (N, C), dtype=jnp.float32, minval=0.1, maxval=1.0)
    targets = raw / jnp.sum(raw, axis=-1, keepdims=True)   # typical soft labels

    # reduction='mean' (module default)
    out_mean = jax.block_until_ready(
        fixed_weighted_soft_target_ce_loss(inputs, targets, class_weights=cw))
    ref_mean = _reference(inputs, targets, cw_arr, False, "mean")
    assert jnp.allclose(out_mean, ref_mean, rtol=1e-5, atol=1e-5), (out_mean, ref_mean)

    # reduction='none' (lane-dense per-sample path)
    out_none = jax.block_until_ready(
        fixed_weighted_soft_target_ce_loss(inputs, targets, class_weights=cw,
                                           reduction="none"))
    ref_none = _reference(inputs, targets, cw_arr, False, "none")
    assert out_none.shape == (N,)
    assert jnp.allclose(out_none, ref_none, rtol=1e-5, atol=1e-5)

    # reduction='sum' with normalize_targets=True (exact reciprocal now)
    out_sum = jax.block_until_ready(
        fixed_weighted_soft_target_ce_loss(inputs, targets, class_weights=cw,
                                           normalize_targets=True, reduction="sum"))
    ref_sum = _reference(inputs, targets, cw_arr, True, "sum")
    assert jnp.allclose(out_sum, ref_sum, rtol=1e-4, atol=1e-4), (out_sum, ref_sum)

    # Multi-block path: grid of >= 2 (v7x megacore split) + last-block mask.
    N2 = 2000
    inputs2 = jax.random.normal(k3, (N2, C), dtype=jnp.float32)
    raw2 = jax.random.uniform(k4, (N2, C), dtype=jnp.float32, minval=0.1, maxval=1.0)
    targets2 = raw2 / jnp.sum(raw2, axis=-1, keepdims=True)

    out2 = jax.block_until_ready(
        fixed_weighted_soft_target_ce_loss(inputs2, targets2, class_weights=cw,
                                           normalize_targets=True, reduction="mean"))
    ref2 = _reference(inputs2, targets2, cw_arr, True, "mean")
    assert jnp.allclose(out2, ref2, rtol=1e-4, atol=1e-4), (out2, ref2)

    print("KERNEL_OK")
</pallas_src>

<mosaic_0001>
module attributes {stable_mosaic.version = 11 : i64} {
  func.func @_weighted_soft_ce_kernel(%arg0: i32, %arg1: memref<3x1x128xf32, #tpu.memory_space<vmem>>, %arg2: memref<3x1x128xf32, #tpu.memory_space<vmem>>, %arg3: memref<1x128xf32, #tpu.memory_space<vmem>>) attributes {dimension_semantics = [#tpu.dimension_semantics<parallel>], iteration_bounds = array<i64: 1>, scalar_prefetch = 0 : i64, scratch_operands = 0 : i64, tpu.core_type = #tpu.core_type<tc>, window_params = [{transform_indices = @transform_0, window_bounds = array<i64: 3, 1, 128>}, {transform_indices = @transform_1, window_bounds = array<i64: 3, 1, 128>}, {transform_indices = @transform_2, window_bounds = array<i64: 1, 128>}]} {
    %c0 = arith.constant 0 : index
    %c0_0 = arith.constant 0 : index
    %c0_1 = arith.constant 0 : index
    %0 = vector.load %arg1[%c0, %c0_0, %c0_1] : memref<3x1x128xf32, #tpu.memory_space<vmem>>, vector<3x1x128xf32>
    %c0_2 = arith.constant 0 : index
    %c0_3 = arith.constant 0 : index
    %c0_4 = arith.constant 0 : index
    %1 = vector.load %arg2[%c0_2, %c0_3, %c0_4] : memref<3x1x128xf32, #tpu.memory_space<vmem>>, vector<3x1x128xf32>
    %2 = vector.extract_strided_slice %0 {offsets = [0, 0, 0], sizes = [1, 1, 128], strides = [1, 1, 1]} : vector<3x1x128xf32> to vector<1x1x128xf32>
    %3 = vector.shape_cast %2 : vector<1x1x128xf32> to vector<1x128xf32>
    %4 = vector.extract_strided_slice %0 {offsets = [1, 0, 0], sizes = [1, 1, 128], strides = [1, 1, 1]} : vector<3x1x128xf32> to vector<1x1x128xf32>
    %5 = vector.shape_cast %4 : vector<1x1x128xf32> to vector<1x128xf32>
    %6 = vector.extract_strided_slice %0 {offsets = [2, 0, 0], sizes = [1, 1, 128], strides = [1, 1, 1]} : vector<3x1x128xf32> to vector<1x1x128xf32>
    %7 = vector.shape_cast %6 : vector<1x1x128xf32> to vector<1x128xf32>
    %8 = vector.extract_strided_slice %1 {offsets = [0, 0, 0], sizes = [1, 1, 128], strides = [1, 1, 1]} : vector<3x1x128xf32> to vector<1x1x128xf32>
    %9 = vector.shape_cast %8 : vector<1x1x128xf32> to vector<1x128xf32>
    %10 = vector.extract_strided_slice %1 {offsets = [1, 0, 0], sizes = [1, 1, 128], strides = [1, 1, 1]} : vector<3x1x128xf32> to vector<1x1x128xf32>
    %11 = vector.shape_cast %10 : vector<1x1x128xf32> to vector<1x128xf32>
    %12 = vector.extract_strided_slice %1 {offsets = [2, 0, 0], sizes = [1, 1, 128], strides = [1, 1, 1]} : vector<3x1x128xf32> to vector<1x1x128xf32>
    %13 = vector.shape_cast %12 : vector<1x1x128xf32> to vector<1x128xf32>
    %14 = arith.maximumf %3, %5 : vector<1x128xf32>
    %15 = arith.maximumf %14, %7 : vector<1x128xf32>
    %16 = arith.subf %3, %15 : vector<1x128xf32>
    %17 = math.exp %16 : vector<1x128xf32>
    %18 = arith.subf %5, %15 : vector<1x128xf32>
    %19 = math.exp %18 : vector<1x128xf32>
    %20 = arith.addf %17, %19 : vector<1x128xf32>
    %21 = arith.subf %7, %15 : vector<1x128xf32>
    %22 = math.exp %21 : vector<1x128xf32>
    %23 = arith.addf %20, %22 : vector<1x128xf32>
    %24 = math.log %23 : vector<1x128xf32>
    %25 = arith.addf %15, %24 : vector<1x128xf32>
    %26 = arith.mulf %9, %3 : vector<1x128xf32>
    %27 = arith.addf %9, %11 : vector<1x128xf32>
    %28 = arith.mulf %11, %5 : vector<1x128xf32>
    %29 = arith.addf %26, %28 : vector<1x128xf32>
    %30 = arith.addf %27, %13 : vector<1x128xf32>
    %31 = arith.mulf %13, %7 : vector<1x128xf32>
    %32 = arith.addf %29, %31 : vector<1x128xf32>
    %cst = arith.constant 4.000000e+00 : f32
    %33 = vector.broadcast %cst : f32 to vector<1x128xf32>
    %34 = arith.mulf %33, %9 : vector<1x128xf32>
    %cst_5 = arith.constant 4.000000e+00 : f32
    %35 = vector.broadcast %cst_5 : f32 to vector<1x128xf32>
    %36 = arith.mulf %35, %13 : vector<1x128xf32>
    %37 = arith.addf %34, %36 : vector<1x128xf32>
    %38 = arith.mulf %30, %25 : vector<1x128xf32>
    %39 = arith.subf %38, %32 : vector<1x128xf32>
    %40 = arith.mulf %39, %37 : vector<1x128xf32>
    %cst_6 = arith.constant dense<0.000000e+00> : vector<128xf32>
    %41 = vector.multi_reduction <add>, %40, %cst_6 [0] : vector<1x128xf32> to vector<128xf32>
    %42 = vector.shape_cast %41 : vector<128xf32> to vector<1x128xf32>
    %c0_7 = arith.constant 0 : index
    %c0_8 = arith.constant 0 : index
    %43 = vector.load %arg3[%c0_7, %c0_8] : memref<1x128xf32, #tpu.memory_space<vmem>>, vector<1x128xf32>
    tpu.vector_store %arg3[%c0_7, %c0_8], %42 {strides = array<i32>} : memref<1x128xf32, #tpu.memory_space<vmem>>, vector<1x128xf32>,
    return
  }
  func.func @transform_0(%arg0: i32) -> (i32, i32, i32) {
    %c0_i32 = arith.constant 0 : i32
    %c0_i32_0 = arith.constant 0 : i32
    %c0_i32_1 = arith.constant 0 : i32
    return %c0_i32, %arg0, %c0_i32_0 : i32, i32, i32
  }
  func.func @transform_1(%arg0: i32) -> (i32, i32, i32) {
    %c0_i32 = arith.constant 0 : i32
    %c0_i32_0 = arith.constant 0 : i32
    %c0_i32_1 = arith.constant 0 : i32
    return %c0_i32, %arg0, %c0_i32_0 : i32, i32, i32
  }
  func.func @transform_2(%arg0: i32) -> (i32, i32) {
    %c0_i32 = arith.constant 0 : i32
    %c0_i32_0 = arith.constant 0 : i32
    return %c0_i32, %arg0 : i32, i32
  }
}

</mosaic_0001>

<bundles_post_ra>
// kernel: fixed_weighted_soft_target_ce_loss.2
= control target key start
LH: loop header
LB: loop body
LE: loop exit
PB: predicated region body
PF: predicated region fallthrough
CT: control target
= control target key end

     0   :  { %s126_s0 = inlined_call_operand.vmem [shape: f32[3,128], index: 0, kind: input, shape index: {}]   ;;  %s127_s1 = inlined_call_operand.vmem [shape: f32[3,128], index: 1, kind: input, shape index: {}]   ;;  %s128_s2 = inlined_call_operand.vmem [shape: f32[1,128], index: 2, kind: output, shape index: {}]  }
   0x1   :  { %v11_v0 = vld [vmem:[%s127_s1] ss:$0 sm:$0xff]  ;;  %v78_v1 = vld [vmem:[%s127_s1 + $0x1] ss:$0 sm:$0xff]  ;;  %v79_v2 = vld [vmem:[%s127_s1 + $0x2] ss:$0 sm:$0xff] }
   0x2   :  { %13 = vst [vmem:[#allocation2] sm:$0x1] %v11_v0  ;;  %18 = vst [vmem:[#allocation2 + $0x1] sm:$0x1] %v78_v1  ;;  %v24_v3 = vld [vmem:[%s126_s0] ss:$0 sm:$0xff] }
   0x3   :  { %23 = vst [vmem:[#allocation2 + $0x2] sm:$0x1] %v79_v2  ;;  %v80_v4 = vld [vmem:[%s126_s0 + $0x1] ss:$0 sm:$0xff]  ;;  %v81_v5 = vld [vmem:[%s126_s0 + $0x2] ss:$0 sm:$0xff] }
   0x4   :  { %26 = vst [vmem:[#allocation3] sm:$0x1] %v24_v3  ;;  %31 = vst [vmem:[#allocation3 + $0x1] sm:$0x1] %v80_v4 }
   0x5   :  { %36 = vst [vmem:[#allocation3 + $0x2] sm:$0x1] %v81_v5 }
   0x9   :  { %v37_v6 = vld [vmem:[#allocation2] sm:$0x1]  ;;  %v38_v7 = vld [vmem:[#allocation2 + $0x1] sm:$0x1] }
   0xa   :  { %v39_v8 = vld [vmem:[#allocation2 + $0x2] sm:$0x1]  ;;  %v43_v9 = vmax.f32 %v37_v6, %v38_v7 }
   0xb   :  { %v40_v22 = vld [vmem:[#allocation3] sm:$0x1]  ;;  %v41_v23 = vld [vmem:[#allocation3 + $0x1] sm:$0x1] }
   0xc   :  { %v44_v10 = vmax.f32 %v43_v9, %v39_v8  ;;  %v59_v24 = vmul.f32 %v40_v22, %v37_v6  ;;  %v61_v25 = vmul.f32 %v41_v23, %v38_v7  ;;  %v42_v26 = vld [vmem:[#allocation3 + $0x2] sm:$0x1]  ;;  %v60_v27 = vadd.f32 %v41_v23, %v40_v22 }
   0xd   :  { %v64_v29 = vmul.f32 %v42_v26, %v39_v8  ;;  %v66_v33 = vmul.f32 4.0, %v40_v22  ;;  %v67_v34 = vmul.f32 4.0, %v42_v26 }
   0xe   :  { %v45_v11 = vsub.f32 %v37_v6, %v44_v10  ;;  %v48_v12 = vsub.f32 %v38_v7, %v44_v10  ;;  %v52_v13 = vsub.f32 %v39_v8, %v44_v10  ;;  %v62_v28 = vadd.f32 %v61_v25, %v59_v24 }
   0xf   :  { %v63_v32 = vadd.f32 %v60_v27, %v42_v26  ;;  %v68_v37 = vadd.f32 %v67_v34, %v66_v33 }
  0x10   :  { %v46_v14 = vmul.f32 1.442695, %v45_v11  ;;  %v49_v15 = vmul.f32 1.442695, %v48_v12  ;;  %v53_v16 = vmul.f32 1.442695, %v52_v13  ;;  %v65_v36 = vadd.f32 %v64_v29, %v62_v28 }
  0x12   :  { %82 = vpow2.f32 %v46_v14 }
  0x13   :  { %84 = vpow2.f32 %v49_v15 }
  0x14   :  { %86 = vpow2.f32 %v53_v16 }
  0x1c   :  { %v83_v17 = vpop.eup %82 }
  0x1d   :  { %v85_v18 = vpop.eup %84 }
  0x1e   :  { %v87_v19 = vpop.eup %86  ;;  %v51_v20 = vadd.f32 %v85_v18, %v83_v17 }
  0x20   :  { %v55_v21 = vadd.f32 %v87_v19, %v51_v20 }
  0x22   :  { %88 = vlog2.f32 %v55_v21 }
  0x2c   :  { %v89_v30 = vpop.eup %88 }
  0x2d   :  { %v57_v31 = vmul.f32 0.6931472, %v89_v30 }
  0x2f   :  { %v58_v35 = vadd.f32 %v57_v31, %v44_v10 }
  0x31   :  { %v69_v38 = vmul.f32 %v63_v32, %v58_v35 }
  0x33   :  { %v70_v39 = vsub.f32 %v69_v38, %v65_v36 }
  0x35   :  { %v71_v40 = vmul.f32 %v70_v39, %v68_v37 }
  0x37   :  { %73 = vst [vmem:[%s128_s2] sm:$0x1] %v71_v40 }

</bundles_post_ra>
